<compile_context>
chip_gen: v7x
topology: tpu7x:2x2x1
jax: 0.10.0
libtpu: 0.0.40
codegen_flags: <defaults>
</compile_context>

<pallas_src>
import jax
import jax.numpy as jnp
from jax.experimental import pallas as pl
from jax.experimental.pallas import tpu as pltpu

LANES = 512        # lane-dense last dim (multiple of 128)
TILE_ROWS = 1024   # rows per grid step: (1024, 512) f32 = 2 MiB per block


def linreg_kernel(w_ref, b_ref, x_ref, o_ref):
    # w_ref, b_ref: (1,) f32 in SMEM -> scalar broadcast (no HBM re-traffic).
    # x_ref, o_ref: (block_rows, LANES) f32 tiles in VMEM. Pure VPU mul+add.
    o_ref[...] = x_ref[...] * w_ref[0] + b_ref[0]


def _linreg_2d(x2d, w, b):
    """Run the kernel over a lane-dense (rows, LANES) f32 slab."""
    rows, lanes = x2d.shape
    assert lanes == LANES
    # If the slab is smaller than one tile, shrink the block to the full
    # array (always legal); otherwise tile with a possibly-partial last block.
    block_rows = min(TILE_ROWS, rows)
    grid = (pl.cdiv(rows, block_rows),)
    return pl.pallas_call(
        linreg_kernel,
        out_shape=jax.ShapeDtypeStruct((rows, LANES), x2d.dtype),
        grid=grid,
        in_specs=[
            # Scalar parameters live in SMEM for the whole call.
            pl.BlockSpec(memory_space=pltpu.MemorySpace.SMEM),
            pl.BlockSpec(memory_space=pltpu.MemorySpace.SMEM),
            # Lane-dense row tiles, auto double-buffered across the grid.
            pl.BlockSpec((block_rows, LANES), lambda i: (i, 0)),
        ],
        out_specs=pl.BlockSpec((block_rows, LANES), lambda i: (i, 0)),
        compiler_params=pltpu.CompilerParams(
            # NOTE(v7x): pltpu.CORE_PARALLEL here can shard row tiles across
            # both TensorCores of a v7x chip (~2x for this mem-bound loop);
            # "parallel" is the portable choice for single-TC v5e/v6e.
            dimension_semantics=("parallel",),
        ),
        cost_estimate=pl.CostEstimate(
            flops=2 * rows * LANES,
            transcendentals=0,
            bytes_accessed=2 * rows * LANES * x2d.dtype.itemsize,
        ),
    )(w, b, x2d)


def manual_linear_regression(x, weight, bias, *, kernel_min_elems=65536):
    """nn.Linear(1, 1) forward: x (N, 1) f32 -> (N, 1) f32.

    kernel_min_elems: below this many elements, padding + launch overhead
    dominates any kernel; fall back to a plain fused multiply-add in JAX.
    """
    n, in_features = x.shape
    assert in_features == 1 and weight.shape == (1, 1) and bias.shape == (1,)
    w = weight.reshape(1)
    b = bias.reshape(1)
    total = n  # n * in_features, in_features == 1

    # Tiny-batch bypass: one VPU op in plain JAX, no padding, no launch cost.
    if total < kernel_min_elems:
        return x * w[0] + b[0]

    rem = total % LANES
    if rem == 0:
        # Fast path (common large-N case): zero-copy reshape in, zero-copy
        # reshape out. Exactly one HBM read of x and one HBM write of y.
        x2d = x.reshape(total // LANES, LANES)
        out2d = _linreg_2d(x2d, w, b)
        return out2d.reshape(n, in_features)

    # General path: pad only to the next multiple of LANES (<= LANES-1 zeros),
    # run with a possibly-partial last row-block, slice the real rows back.
    pad = LANES - rem
    flat = jnp.pad(x.reshape(-1), (0, pad))
    x2d = flat.reshape((total + pad) // LANES, LANES)
    out2d = _linreg_2d(x2d, w, b)
    return out2d.reshape(-1)[:total].reshape(n, in_features)


if __name__ == "__main__":
    key = jax.random.PRNGKey(0)
    kx, kw, kb = jax.random.split(key, 3)

    # nn.Linear(1, 1) default init: U(-1/sqrt(in), 1/sqrt(in)) = U(-1, 1).
    weight = jax.random.uniform(kw, (1, 1), jnp.float32, minval=-1.0, maxval=1.0)
    bias = jax.random.uniform(kb, (1,), jnp.float32, minval=-1.0, maxval=1.0)

    # 1) Lane-aligned small batch: exercises the zero-copy kernel fast path.
    n = 1024
    x = jax.random.normal(kx, (n, 1), jnp.float32)
    y = manual_linear_regression(x, weight, bias, kernel_min_elems=0)
    y = jax.block_until_ready(y)
    y_ref = x @ weight.T + bias
    assert y.shape == (n, 1)
    assert jnp.allclose(y, y_ref, atol=1e-6), (y, y_ref)

    # 2) Unaligned tiny batch: exercises the padded / partial-block path.
    x2 = jax.random.normal(kx, (8, 1), jnp.float32)
    y2 = jax.block_until_ready(
        manual_linear_regression(x2, weight, bias, kernel_min_elems=0))
    assert y2.shape == (8, 1)
    assert jnp.allclose(y2, x2 @ weight.T + bias, atol=1e-6)

    # 3) Default small-batch bypass (plain JAX, no kernel launch).
    y3 = jax.block_until_ready(manual_linear_regression(x2, weight, bias))
    assert jnp.allclose(y3, x2 @ weight.T + bias, atol=1e-6)

    print("KERNEL_OK")
</pallas_src>

<mosaic_0001>
module attributes {stable_mosaic.version = 11 : i64} {
  func.func @linreg_kernel(%arg0: i32, %arg1: memref<1xf32, #tpu.memory_space<smem>>, %arg2: memref<1xf32, #tpu.memory_space<smem>>, %arg3: memref<2x512xf32, #tpu.memory_space<vmem>>, %arg4: memref<2x512xf32, #tpu.memory_space<vmem>>) attributes {dimension_semantics = [#tpu.dimension_semantics<parallel>], iteration_bounds = array<i64: 1>, scalar_prefetch = 0 : i64, scratch_operands = 0 : i64, tpu.core_type = #tpu.core_type<tc>, window_params = [{transform_indices = @transform_0, window_bounds = array<i64: 1>}, {transform_indices = @transform_1, window_bounds = array<i64: 1>}, {transform_indices = @transform_2, window_bounds = array<i64: 2, 512>}, {transform_indices = @transform_3, window_bounds = array<i64: 2, 512>}]} {
    %c0 = arith.constant 0 : index
    %c0_0 = arith.constant 0 : index
    %0 = vector.load %arg3[%c0, %c0_0] : memref<2x512xf32, #tpu.memory_space<vmem>>, vector<2x512xf32>
    %c0_1 = arith.constant 0 : index
    %1 = memref.load %arg1[%c0_1] : memref<1xf32, #tpu.memory_space<smem>>
    %2 = vector.broadcast %1 : f32 to vector<2x512xf32>
    %3 = arith.mulf %0, %2 : vector<2x512xf32>
    %c0_2 = arith.constant 0 : index
    %4 = memref.load %arg2[%c0_2] : memref<1xf32, #tpu.memory_space<smem>>
    %5 = vector.broadcast %4 : f32 to vector<2x512xf32>
    %6 = arith.addf %3, %5 : vector<2x512xf32>
    %c0_3 = arith.constant 0 : index
    %c0_4 = arith.constant 0 : index
    %7 = vector.load %arg4[%c0_3, %c0_4] : memref<2x512xf32, #tpu.memory_space<vmem>>, vector<2x512xf32>
    tpu.vector_store %arg4[%c0_3, %c0_4], %6 {strides = array<i32>} : memref<2x512xf32, #tpu.memory_space<vmem>>, vector<2x512xf32>,
    return
  }
  func.func @transform_0(%arg0: i32) -> i32 {
    %c0_i32 = arith.constant 0 : i32
    %c0_i32_0 = arith.constant 0 : i32
    return %c0_i32 : i32
  }
  func.func @transform_1(%arg0: i32) -> i32 {
    %c0_i32 = arith.constant 0 : i32
    %c0_i32_0 = arith.constant 0 : i32
    return %c0_i32 : i32
  }
  func.func @transform_2(%arg0: i32) -> (i32, i32) {
    %c0_i32 = arith.constant 0 : i32
    %c0_i32_0 = arith.constant 0 : i32
    return %arg0, %c0_i32 : i32, i32
  }
  func.func @transform_3(%arg0: i32) -> (i32, i32) {
    %c0_i32 = arith.constant 0 : i32
    %c0_i32_0 = arith.constant 0 : i32
    return %arg0, %c0_i32 : i32, i32
  }
}

</mosaic_0001>

<bundles_post_ra>
// kernel: tpu_custom_call.1
= control target key start
LH: loop header
LB: loop body
LE: loop exit
PB: predicated region body
PF: predicated region fallthrough
CT: control target
= control target key end

     0   :  { %10 = vsyncpa [#allocation5], 0  ;;  %s154_s0 = inlined_call_operand.<no memory space> [shape: f32[1], index: 0, kind: input, shape index: {}]   ;;  %s155_s1 = inlined_call_operand.<no memory space> [shape: f32[1], index: 1, kind: input, shape index: {}]   ;;  %s156_s2 = inlined_call_operand.hbm [shape: f32[2,512], index: 2, kind: input, shape index: {}]   ;;  %s157_s3 = inlined_call_operand.hbm [shape: f32[2,512], index: 3, kind: output, shape index: {}]  }
   0x1   :  { %11 = vsyncpa [#allocation6], 0  ;;  %s102_s12 = smov [#allocation4]   ;;  %s54_s16 = scalar_lea.hbm %s156_s2, 128 }
   0x2   :  { %s22_s13 = sshll.u32 %s102_s12, 4  ;;  %p55_p0 = scmp.ne.s32.totalorder %s156_s2, %s54_s16  ;;  %s23_s13 = int_to_ptr.vmem [resolvable:$true] %s22_s13 }
   0x3   :  { %p58_p1 = scmp.lt.u32.totalorder %s54_s16, %s156_s2 }
   0x5   :  { %p60_p2 = pnand %p58_p1, %p55_p0 }
   0x7   :  { %63 = shalt.err (!%p60_p2)
}
   0x8   :  { %s64_s21 = scalar_lea.vmem %s23_s13, 128  ;;  %p69_p4 = scmp.lt.s32.totalorder %s23_s13, %s23_s13 }
   0x9   :  { %p65_p3 = scmp.ne.s32.totalorder %s23_s13, %s64_s21  ;;  %p70_p5 = scmp.lt.s32.totalorder %s64_s21, %s64_s21 }
   0xb   :  { %p71_p6 = por %p70_p5, %p69_p4 }
   0xd   :  { %p72_p7 = pnand %p71_p6, %p65_p3 }
   0xf   :  { %75 = shalt.err (!%p72_p7)
}
  0x10   :  { %25 = dma.hbm_to_vmem [thread:$0]  %s156_s2, 128, %s23_s13, [#allocation5]  }
  0x11   :  { %98 = dma.done.wait [#allocation5], 128  }
  0x12   :  { %99 = vsyncadd [#allocation5], 4294967168  ;;  %v31_v0 = vstv %s154_s0  ;;  %v29_v1 = vld [vmem:[#allocation4] sm:$0xff]  ;;  %v34_v2 = vstv %s155_s1  ;;  %s103_s28 = smov [#allocation7]  }
  0x13   :  { %s43_s29 = sshll.u32 %s103_s28, 4  ;;  %v32_v3 = vmul.f32 %v31_v0, %v29_v1  ;;  %s44_s29 = int_to_ptr.vmem [resolvable:$true] %s43_s29 }
  0x14   :  { %s76_s30 = scalar_lea.vmem %s44_s29, 128  ;;  %p81_p9 = scmp.lt.s32.totalorder %s44_s29, %s44_s29 }
  0x15   :  { %v35_v4 = vadd.f32 %v34_v2, %v32_v3  ;;  %p77_p8 = scmp.ne.s32.totalorder %s44_s29, %s76_s30  ;;  %p82_p10 = scmp.lt.s32.totalorder %s76_s30, %s76_s30 }
  0x17   :  { %36 = vst [vmem:[#allocation7] sm:$0xff] %v35_v4  ;;  %p83_p11 = por %p82_p10, %p81_p9 }
  0x19   :  { %p84_p12 = pnand %p83_p11, %p77_p8 }
  0x1b   :  { %87 = shalt.err (!%p84_p12)
}
  0x1c   :  { %s88_s4 = scalar_lea.hbm %s157_s3, 128 }
  0x1d   :  { %p89_p13 = scmp.ne.s32.totalorder %s157_s3, %s88_s4  ;;  %p92_p0 = scmp.lt.u32.totalorder %s88_s4, %s157_s3 }
  0x1f   :  { %p94_p1 = pnand %p92_p0, %p89_p13 }
  0x21   :  { %97 = shalt.err (!%p94_p1)
}
  0x22   :  { %46 = dma.vmem_to_hbm [thread:$0]  %s44_s29, 128, %s157_s3, [#allocation6]  }
  0x23   :  { %100 = dma.done.wait [#allocation6], 128  }
  0x24   :  { %101 = vsyncadd [#allocation6], 4294967168 }
  0x25   :  { %50 = vsyncpa [#allocation5], 1 }
  0x26   :  { %51 = vsyncpa [#allocation6], 1 }

</bundles_post_ra>
